<compile_context>
chip_gen: v7x
topology: tpu7x:2x2x1
jax: 0.10.0
libtpu: 0.0.40
codegen_flags: <defaults>
</compile_context>

<pallas_src>
import jax
import jax.numpy as jnp
from jax import lax
from jax.experimental import pallas as pl
from jax.experimental.pallas import tpu as pltpu


# ----------------------------- helpers --------------------------------------

def _round_up(x, m):
    return ((x + m - 1) // m) * m


def _select_tile(dim, unit, max_tile, slack=1.08):
    """(tile, padded_dim): tile is a multiple of `unit`, padded_dim a multiple
    of tile.  Minimizes padding (within `slack`), then prefers the largest
    acceptable tile (fewer grid steps / less re-streaming)."""
    padded_full = _round_up(dim, unit)
    if padded_full <= max_tile:
        return padded_full, padded_full
    cands = list(range(unit, max_tile + 1, unit))
    best_pad = min(_round_up(dim, t) for t in cands)
    limit = int(best_pad * slack)
    ok = [t for t in cands if _round_up(dim, t) <= limit]
    tile = max(ok)
    return tile, _round_up(dim, tile)


def _vmem_capacity_bytes():
    try:
        info = pltpu.get_tpu_info()
        for attr in ("vmem_capacity_bytes", "vmem_size_bytes", "vmem_bytes"):
            v = getattr(info, attr, None)
            if v:
                return int(v)
    except Exception:
        pass
    return 64 * (1 << 20)          # conservative (v7x-sized) fallback


def _hw_config():
    cap = _vmem_capacity_bytes()
    if cap >= 100 * (1 << 20):     # v5e / v6e: 128 MiB physical VMEM
        vmem_limit = 96 * (1 << 20)
        lane_cap = 2048
    else:                          # v7x: 64 MiB per TensorCore
        vmem_limit = 48 * (1 << 20)
        lane_cap = 1024
    return dict(
        vmem_limit=vmem_limit,
        budget=vmem_limit - 6 * (1 << 20),   # headroom for compiler scratch
        n_cap=512,       # sublane-tile cap, 2-D paths
        n_cap3=256,      # sublane-tile cap, grouped 3-D path (x g members)
        lane_cap=lane_cap,
    )


def _pick_k(in_f, max_rows, cols, itemsize, budget, group=1):
    """Choose the K tiling.  Returns (t_k, k_pad, single_k).  single_k=True
    means one full-K tile (no accumulator needed)."""
    k_full = _round_up(in_f, 128)

    def ws(t_k, with_acc):
        s = 2 * group * (max_rows * t_k + t_k * cols + 8 * cols) * itemsize
        s += 2 * group * max_rows * cols * 4          # output buffers (<= f32)
        if with_acc:
            s += group * max_rows * cols * 4          # f32 accumulator
        return s

    if ws(k_full, False) <= budget:
        return k_full, k_full, True
    t = 128
    while t + 128 < k_full and ws(t + 128, True) <= budget:
        t += 128
    t_k, k_pad = _select_tile(in_f, 128, t)
    return t_k, k_pad, (k_pad == t_k)


def _is_tiny(E, N, in_f, out_f):
    padded_flops = (2 * _round_up(N, 8) * _round_up(in_f, 128)
                    * _round_up(E * out_f, 128))
    return padded_flops < (1 << 21)


# ----------------------------- kernels --------------------------------------

def _make_kernel_2d(multi_k, rank3_out):
    """Kernel for 2-D x.  rank3_out=False: fused (N, E*out) output;
    rank3_out=True: per-member (1, t_n, t_o) output block."""
    k_axis = 3 if rank3_out else 2

    def _bias(b_ref):
        b = b_ref[...].astype(jnp.float32)
        return b[0] if rank3_out else b              # (1, t_cols)

    def _store(o_ref, acc, b_ref):
        res = (acc + _bias(b_ref)).astype(o_ref.dtype)
        o_ref[...] = res[None] if rank3_out else res

    if multi_k:
        def kernel(x_ref, w_ref, b_ref, o_ref, acc_ref):
            k = pl.program_id(k_axis)

            @pl.when(k == 0)
            def _():
                acc_ref[...] = jnp.zeros_like(acc_ref)

            acc_ref[...] += jnp.dot(x_ref[...], w_ref[...],
                                    preferred_element_type=jnp.float32)

            @pl.when(k == pl.num_programs(k_axis) - 1)
            def _():
                _store(o_ref, acc_ref[...], b_ref)
    else:
        def kernel(x_ref, w_ref, b_ref, o_ref):
            acc = jnp.dot(x_ref[...], w_ref[...],
                          preferred_element_type=jnp.float32)
            _store(o_ref, acc, b_ref)
    return kernel


def _make_kernel_3d(multi_k):
    """Kernel for 3-D x: grouped batched matmul 'gni,gio->gno'."""
    def _mm(x_ref, w_ref):
        return lax.dot_general(
            x_ref[...], w_ref[...],
            dimension_numbers=(((2,), (1,)), ((0,), (0,))),
            preferred_element_type=jnp.float32)

    if multi_k:
        def kernel(x_ref, w_ref, b_ref, o_ref, acc_ref):
            k = pl.program_id(3)

            @pl.when(k == 0)
            def _():
                acc_ref[...] = jnp.zeros_like(acc_ref)

            acc_ref[...] += _mm(x_ref, w_ref)

            @pl.when(k == pl.num_programs(3) - 1)
            def _():
                o_ref[...] = (acc_ref[...] + b_ref[...].astype(jnp.float32)
                              ).astype(o_ref.dtype)
    else:
        def kernel(x_ref, w_ref, b_ref, o_ref):
            o_ref[...] = (_mm(x_ref, w_ref) + b_ref[...].astype(jnp.float32)
                          ).astype(o_ref.dtype)
    return kernel


# -------------------- weight preparation (one-time) -------------------------

def _prep_2d_fused(weight, bias, cdtype, cfg):
    E, in_f, out_f = weight.shape
    EO = E * out_f
    itemsize = jnp.dtype(cdtype).itemsize
    t_eo, eo_pad = _select_tile(EO, 128, cfg["lane_cap"])
    t_k, k_pad, single_k = _pick_k(in_f, cfg["n_cap"], t_eo, itemsize,
                                   cfg["budget"])
    w = jnp.transpose(weight.astype(cdtype), (1, 0, 2)).reshape(in_f, EO)
    w = jnp.pad(w, ((0, k_pad - in_f), (0, eo_pad - EO)))
    b = jnp.pad(bias.astype(jnp.float32).reshape(1, EO),
                ((0, 0), (0, eo_pad - EO)))
    return dict(kind="fused2d", w=w, b=b, E=E, in_f=in_f, out_f=out_f,
                t_eo=t_eo, eo_pad=eo_pad, t_k=t_k, k_pad=k_pad,
                single_k=single_k)


def _prep_2d_pm(weight, bias, cdtype, cfg):
    E, in_f, out_f = weight.shape
    itemsize = jnp.dtype(cdtype).itemsize
    t_o, o_pad = _select_tile(out_f, 128, cfg["lane_cap"])
    t_k, k_pad, single_k = _pick_k(in_f, cfg["n_cap"], t_o, itemsize,
                                   cfg["budget"])
    w = jnp.pad(weight.astype(cdtype),
                ((0, 0), (0, k_pad - in_f), (0, o_pad - out_f)))
    w = jnp.transpose(w, (1, 0, 2)).reshape(k_pad, E * o_pad)
    b = jnp.pad(bias.astype(jnp.float32),
                ((0, 0), (0, 0), (0, o_pad - out_f)))          # (E, 1, o_pad)
    return dict(kind="pm2d", w=w, b=b, E=E, in_f=in_f, out_f=out_f,
                t_o=t_o, o_pad=o_pad, t_k=t_k, k_pad=k_pad, single_k=single_k)


def _prep_3d(weight, bias, cdtype, cfg):
    E, in_f, out_f = weight.shape
    itemsize = jnp.dtype(cdtype).itemsize
    g = min(E, 8)
    e_pad = _round_up(E, g)
    t_o, o_pad = _select_tile(out_f, 128, cfg["lane_cap"])
    t_k, k_pad, single_k = _pick_k(in_f, cfg["n_cap3"], t_o, itemsize,
                                   cfg["budget"], group=g)
    w = jnp.pad(weight.astype(cdtype),
                ((0, e_pad - E), (0, k_pad - in_f), (0, o_pad - out_f)))
    b = jnp.pad(bias.astype(jnp.float32),
                ((0, e_pad - E), (0, 0), (0, o_pad - out_f)))
    return dict(kind="3d", w=w, b=b, E=E, in_f=in_f, out_f=out_f, g=g,
                e_pad=e_pad, t_o=t_o, o_pad=o_pad, t_k=t_k, k_pad=k_pad,
                single_k=single_k)


# ----------------------------- apply paths -----------------------------------

def _apply_2d_fused(x, prep, out_dtype, cfg):
    N, in_f = x.shape
    assert in_f == prep["in_f"]
    E, out_f = prep["E"], prep["out_f"]
    w, b = prep["w"], prep["b"]
    t_eo, eo_pad = prep["t_eo"], prep["eo_pad"]
    t_k, k_pad, single_k = prep["t_k"], prep["k_pad"], prep["single_k"]
    s = jnp.dtype(w.dtype).itemsize
    n_unit = 16 if s == 2 else 8
    t_n, n_pad = _select_tile(N, n_unit, cfg["n_cap"])

    x_p = jnp.pad(x.astype(w.dtype), ((0, n_pad - N), (0, k_pad - in_f)))

    n_tiles, eo_tiles, k_tiles = n_pad // t_n, eo_pad // t_eo, k_pad // t_k
    # Give the second TensorCore (v7x megacore) work if the parallel grid
    # would otherwise be a single block.
    if n_tiles * eo_tiles == 1 and t_eo % 256 == 0:
        t_eo //= 2
        eo_tiles = eo_pad // t_eo

    # Note: for latency-exposed configs, pl.Buffered(3) on the weight spec is
    # worth sweeping once tiles are fixed.
    if single_k:
        grid = (n_tiles, eo_tiles)
        in_specs = [
            pl.BlockSpec((t_n, t_k), lambda n, eo: (n, 0)),
            pl.BlockSpec((t_k, t_eo), lambda n, eo: (0, eo)),
            pl.BlockSpec((1, t_eo), lambda n, eo: (0, eo)),
        ]
        out_specs = pl.BlockSpec((t_n, t_eo), lambda n, eo: (n, eo))
        scratch = ()
        dims = ("parallel", "parallel")
    else:
        grid = (n_tiles, eo_tiles, k_tiles)
        in_specs = [
            pl.BlockSpec((t_n, t_k), lambda n, eo, k: (n, k)),
            pl.BlockSpec((t_k, t_eo), lambda n, eo, k: (k, eo)),
            pl.BlockSpec((1, t_eo), lambda n, eo, k: (0, eo)),
        ]
        out_specs = pl.BlockSpec((t_n, t_eo), lambda n, eo, k: (n, eo))
        scratch = (pltpu.VMEM((t_n, t_eo), jnp.float32),)
        dims = ("parallel", "parallel", "arbitrary")

    out_s = jnp.dtype(out_dtype).itemsize
    flops = 2 * n_pad * k_pad * eo_pad
    bytes_accessed = (x_p.size * s * eo_tiles + w.size * s * n_tiles
                      + b.size * 4 + n_pad * eo_pad * out_s)

    out_p = pl.pallas_call(
        _make_kernel_2d(multi_k=not single_k, rank3_out=False),
        out_shape=jax.ShapeDtypeStruct((n_pad, eo_pad), out_dtype),
        grid_spec=pltpu.PrefetchScalarGridSpec(
            num_scalar_prefetch=0, grid=grid, in_specs=in_specs,
            out_specs=out_specs, scratch_shapes=scratch),
        compiler_params=pltpu.CompilerParams(
            dimension_semantics=dims, vmem_limit_bytes=cfg["vmem_limit"]),
        cost_estimate=pl.CostEstimate(flops=flops, transcendentals=0,
                                      bytes_accessed=bytes_accessed),
    )(x_p, w, b)

    out = out_p[:N, :E * out_f].reshape(N, E, out_f)
    return jnp.transpose(out, (1, 0, 2))


def _apply_2d_pm(x, prep, out_dtype, cfg):
    N, in_f = x.shape
    assert in_f == prep["in_f"]
    E, out_f = prep["E"], prep["out_f"]
    w, b = prep["w"], prep["b"]
    t_o, o_pad = prep["t_o"], prep["o_pad"]
    t_k, k_pad, single_k = prep["t_k"], prep["k_pad"], prep["single_k"]
    s = jnp.dtype(w.dtype).itemsize
    n_unit = 16 if s == 2 else 8
    t_n, n_pad = _select_tile(N, n_unit, cfg["n_cap"])

    x_p = jnp.pad(x.astype(w.dtype), ((0, n_pad - N), (0, k_pad - in_f)))

    n_tiles, o_tiles, k_tiles = n_pad // t_n, o_pad // t_o, k_pad // t_k

    if single_k:
        grid = (E, n_tiles, o_tiles)
        in_specs = [
            pl.BlockSpec((t_n, t_k), lambda e, n, o: (n, 0)),
            pl.BlockSpec((t_k, t_o), lambda e, n, o: (0, e * o_tiles + o)),
            pl.BlockSpec((1, 1, t_o), lambda e, n, o: (e, 0, o)),
        ]
        out_specs = pl.BlockSpec((1, t_n, t_o), lambda e, n, o: (e, n, o))
        scratch = ()
        dims = ("parallel", "parallel", "parallel")
    else:
        grid = (E, n_tiles, o_tiles, k_tiles)
        in_specs = [
            pl.BlockSpec((t_n, t_k), lambda e, n, o, k: (n, k)),
            pl.BlockSpec((t_k, t_o),
                         lambda e, n, o, k: (k, e * o_tiles + o)),
            pl.BlockSpec((1, 1, t_o), lambda e, n, o, k: (e, 0, o)),
        ]
        out_specs = pl.BlockSpec((1, t_n, t_o), lambda e, n, o, k: (e, n, o))
        scratch = (pltpu.VMEM((t_n, t_o), jnp.float32),)
        dims = ("parallel", "parallel", "parallel", "arbitrary")

    out_s = jnp.dtype(out_dtype).itemsize
    flops = 2 * n_pad * k_pad * E * o_pad
    bytes_accessed = (x_p.size * s * E * o_tiles + w.size * s * n_tiles
                      + b.size * 4 + E * n_pad * o_pad * out_s)

    out_p = pl.pallas_call(
        _make_kernel_2d(multi_k=not single_k, rank3_out=True),
        out_shape=jax.ShapeDtypeStruct((E, n_pad, o_pad), out_dtype),
        grid_spec=pltpu.PrefetchScalarGridSpec(
            num_scalar_prefetch=0, grid=grid, in_specs=in_specs,
            out_specs=out_specs, scratch_shapes=scratch),
        compiler_params=pltpu.CompilerParams(
            dimension_semantics=dims, vmem_limit_bytes=cfg["vmem_limit"]),
        cost_estimate=pl.CostEstimate(flops=flops, transcendentals=0,
                                      bytes_accessed=bytes_accessed),
    )(x_p, w, b)

    return out_p[:, :N, :out_f]


def _apply_3d(x, prep, out_dtype, cfg):
    E, N, in_f = x.shape
    assert in_f == prep["in_f"] and E == prep["E"]
    out_f = prep["out_f"]
    w, b = prep["w"], prep["b"]
    g, e_pad = prep["g"], prep["e_pad"]
    t_o, o_pad = prep["t_o"], prep["o_pad"]
    t_k, k_pad, single_k = prep["t_k"], prep["k_pad"], prep["single_k"]
    s = jnp.dtype(w.dtype).itemsize
    n_unit = 16 if s == 2 else 8
    t_n, n_pad = _select_tile(N, n_unit, cfg["n_cap3"])

    x_p = jnp.pad(x.astype(w.dtype),
                  ((0, e_pad - E), (0, n_pad - N), (0, k_pad - in_f)))

    e_tiles, n_tiles, o_tiles = e_pad // g, n_pad // t_n, o_pad // t_o
    k_tiles = k_pad // t_k
    if e_tiles * n_tiles * o_tiles == 1 and t_o % 256 == 0:
        t_o //= 2
        o_tiles = o_pad // t_o

    if single_k:
        grid = (e_tiles, n_tiles, o_tiles)
        in_specs = [
            pl.BlockSpec((g, t_n, t_k), lambda e, n, o: (e, n, 0)),
            pl.BlockSpec((g, t_k, t_o), lambda e, n, o: (e, 0, o)),
            pl.BlockSpec((g, 1, t_o), lambda e, n, o: (e, 0, o)),
        ]
        out_specs = pl.BlockSpec((g, t_n, t_o), lambda e, n, o: (e, n, o))
        scratch = ()
        dims = ("parallel", "parallel", "parallel")
    else:
        grid = (e_tiles, n_tiles, o_tiles, k_tiles)
        in_specs = [
            pl.BlockSpec((g, t_n, t_k), lambda e, n, o, k: (e, n, k)),
            pl.BlockSpec((g, t_k, t_o), lambda e, n, o, k: (e, k, o)),
            pl.BlockSpec((g, 1, t_o), lambda e, n, o, k: (e, 0, o)),
        ]
        out_specs = pl.BlockSpec((g, t_n, t_o), lambda e, n, o, k: (e, n, o))
        scratch = (pltpu.VMEM((g, t_n, t_o), jnp.float32),)
        dims = ("parallel", "parallel", "parallel", "arbitrary")

    out_s = jnp.dtype(out_dtype).itemsize
    flops = 2 * e_pad * n_pad * k_pad * o_pad
    bytes_accessed = (x_p.size * s * o_tiles + w.size * s * n_tiles
                      + b.size * 4 + e_pad * n_pad * o_pad * out_s)

    out_p = pl.pallas_call(
        _make_kernel_3d(multi_k=not single_k),
        out_shape=jax.ShapeDtypeStruct((e_pad, n_pad, o_pad), out_dtype),
        grid_spec=pltpu.PrefetchScalarGridSpec(
            num_scalar_prefetch=0, grid=grid, in_specs=in_specs,
            out_specs=out_specs, scratch_shapes=scratch),
        compiler_params=pltpu.CompilerParams(
            dimension_semantics=dims, vmem_limit_bytes=cfg["vmem_limit"]),
        cost_estimate=pl.CostEstimate(flops=flops, transcendentals=0,
                                      bytes_accessed=bytes_accessed),
    )(x_p, w, b)

    return out_p[:E, :N, :out_f]


# ----------------------------- public API ------------------------------------

class EnsembleLinearPallas:
    """EnsembleLinear.forward with weight fusion/padding/cast hoisted to init.

    compute_dtype=jnp.bfloat16 (default) runs the MXU matmul in bf16 with f32
    accumulation (output dtype unchanged).  Pass compute_dtype=None for exact
    f32 compute matching the PyTorch module bit-for-bit-ish.
    """

    def __init__(self, weight, bias, *, compute_dtype=jnp.bfloat16,
                 _cfg_override=None):
        E, in_f, out_f = weight.shape
        self.E, self.in_f, self.out_f = E, in_f, out_f
        self.weight, self.bias = weight, bias        # for tiny-shape bypass
        self.param_dtype = weight.dtype
        self.compute_dtype = (jnp.dtype(compute_dtype)
                              if compute_dtype is not None
                              else jnp.dtype(weight.dtype))
        self.cfg = dict(_hw_config())
        if _cfg_override:
            self.cfg.update(_cfg_override)
        # 2-D x layout: per-member direct (E,N,out) stores unless per-member
        # lane padding would cost >25% over the cross-member fused layout.
        self._per_member = (E * _round_up(out_f, 128)
                            <= int(1.25 * _round_up(E * out_f, 128)))
        prep2 = _prep_2d_pm if self._per_member else _prep_2d_fused
        self._prep2d = prep2(weight, bias, self.compute_dtype, self.cfg)
        self._prep3d = _prep_3d(weight, bias, self.compute_dtype, self.cfg)

    def __call__(self, x, *, force_pallas=False):
        out_dtype = jnp.result_type(x.dtype, self.param_dtype)
        n = x.shape[1] if x.ndim == 3 else x.shape[0]
        if not force_pallas and _is_tiny(self.E, n, self.in_f, self.out_f):
            # pallas_call fixed cost would dominate; let XLA fuse it.
            if x.ndim == 2:
                y = jnp.einsum("ij,bjk->bik", x, self.weight)
            else:
                y = jnp.einsum("bij,bjk->bik", x, self.weight)
            return (y + self.bias).astype(out_dtype)
        if x.ndim == 2:
            assert x.shape[1] == self.in_f
            apply2 = _apply_2d_pm if self._per_member else _apply_2d_fused
            return apply2(x, self._prep2d, out_dtype, self.cfg)
        assert x.ndim == 3 and x.shape[0] == self.E and x.shape[2] == self.in_f
        return _apply_3d(x, self._prep3d, out_dtype, self.cfg)


def ensemble_linear(x, weight, bias, *, compute_dtype=None, force_pallas=False):
    """Functional EnsembleLinear.forward (weight prep happens per call; prefer
    EnsembleLinearPallas to hoist the fuse/pad/cast out of the step)."""
    mod = EnsembleLinearPallas(weight, bias, compute_dtype=compute_dtype)
    return mod(x, force_pallas=force_pallas)


def init_ensemble_linear_params(key, in_features, out_features,
                                ensemble_size=7, dtype=jnp.float32):
    """Mirror of the PyTorch init: weight ~ trunc_normal(std=1/(2*sqrt(in)),
    cutoff +-2 absolute), bias = 0."""
    std = 1.0 / (2.0 * in_features ** 0.5)
    z = jax.random.truncated_normal(
        key, lower=-2.0 / std, upper=2.0 / std,
        shape=(ensemble_size, in_features, out_features), dtype=jnp.float32)
    weight = (z * std).astype(dtype)
    bias = jnp.zeros((ensemble_size, 1, out_features), dtype=dtype)
    return weight, bias


# ----------------------------- demo / checks --------------------------------

if __name__ == "__main__":
    key = jax.random.PRNGKey(0)
    k1, k2, k3, k4, k5, k6, k7 = jax.random.split(key, 7)
    hi = jax.lax.Precision.HIGHEST

    def ref(x, w, b):
        if x.ndim == 2:
            return jnp.einsum("ij,bjk->bik", x, w, precision=hi) + b
        return jnp.einsum("bij,bjk->bik", x, w, precision=hi) + b

    # 1) module-default small shapes (fused 2-D layout, forced through Pallas)
    E, in_f, out_f, N = 7, 32, 32, 8
    w, b = init_ensemble_linear_params(k1, in_f, out_f, E)
    b = b + 0.1 * jnp.arange(out_f, dtype=jnp.float32)[None, None, :]
    x2 = jax.random.normal(k2, (N, in_f), jnp.float32)
    x3 = jax.random.normal(k3, (E, N, in_f), jnp.float32)
    o2 = jax.block_until_ready(ensemble_linear(x2, w, b, force_pallas=True))
    o3 = jax.block_until_ready(ensemble_linear(x3, w, b, force_pallas=True))
    assert o2.shape == (E, N, out_f) and o3.shape == (E, N, out_f)
    assert jnp.allclose(o2, ref(x2, w, b), atol=1e-5, rtol=1e-5), "2-D mismatch"
    assert jnp.allclose(o3, ref(x3, w, b), atol=1e-5, rtol=1e-5), "3-D mismatch"
    # tiny-shape einsum bypass must also match
    assert jnp.allclose(ensemble_linear(x2, w, b), ref(x2, w, b),
                        atol=1e-5, rtol=1e-5), "bypass mismatch"

    # 2) odd, unaligned shapes: exercise the padding paths
    Eo, ino, outo, No = 3, 20, 24, 5
    wo, bo = init_ensemble_linear_params(k4, ino, outo, Eo)
    bo = bo + 0.05
    xo2 = jax.random.normal(k5, (No, ino), jnp.float32)
    xo3 = jax.random.normal(k5, (Eo, No, ino), jnp.float32)
    assert jnp.allclose(
        jax.block_until_ready(ensemble_linear(xo2, wo, bo, force_pallas=True)),
        ref(xo2, wo, bo), atol=1e-5, rtol=1e-5), "odd 2-D mismatch"
    assert jnp.allclose(
        jax.block_until_ready(ensemble_linear(xo3, wo, bo, force_pallas=True)),
        ref(xo3, wo, bo), atol=1e-5, rtol=1e-5), "odd 3-D mismatch"

    # 3) medium shapes: per-member 2-D layout, natural Pallas dispatch, prepared module
    Em, inm, outm, Nm = 7, 160, 96, 40
    wm, bm = init_ensemble_linear_params(k6, inm, outm, Em)
    bm = bm + 0.1 * jnp.arange(outm, dtype=jnp.float32)[None, None, :]
    xm2 = jax.random.normal(k7, (Nm, inm), jnp.float32)
    xm3 = jax.random.normal(k7, (Em, Nm, inm), jnp.float32)
    r2, r3 = ref(xm2, wm, bm), ref(xm3, wm, bm)
    mod_f32 = EnsembleLinearPallas(wm, bm, compute_dtype=None)
    assert jnp.allclose(jax.block_until_ready(mod_f32(xm2)), r2,
                        atol=1e-4, rtol=1e-4), "medium 2-D mismatch"
    assert jnp.allclose(jax.block_until_ready(mod_f32(xm3)), r3,
                        atol=1e-4, rtol=1e-4), "medium 3-D mismatch"

    # 4) default bf16 compute (f32 accumulation/output), loose tolerance
    mod_bf16 = EnsembleLinearPallas(wm, bm)
    ob2 = jax.block_until_ready(mod_bf16(xm2))
    ob3 = jax.block_until_ready(mod_bf16(xm3))
    assert ob2.dtype == jnp.float32 and ob3.dtype == jnp.float32
    assert jnp.allclose(ob2, r2, atol=6e-2, rtol=6e-2), "bf16 2-D mismatch"
    assert jnp.allclose(ob3, r3, atol=6e-2, rtol=6e-2), "bf16 3-D mismatch"

    # 5) force the tiled-K accumulator path with an artificially small budget
    mod_ktile = EnsembleLinearPallas(wm, bm, compute_dtype=None,
                                     _cfg_override={"budget": 1 << 20})
    assert jnp.allclose(jax.block_until_ready(mod_ktile(xm2)), r2,
                        atol=1e-4, rtol=1e-4), "K-tiled 2-D mismatch"
    assert jnp.allclose(jax.block_until_ready(mod_ktile(xm3)), r3,
                        atol=1e-4, rtol=1e-4), "K-tiled 3-D mismatch"

    print("KERNEL_OK")
</pallas_src>

<mosaic_0001>
module attributes {stable_mosaic.version = 11 : i64} {
  func.func @kernel(%arg0: i32, %arg1: i32, %arg2: memref<8x128xf32, #tpu.memory_space<vmem>>, %arg3: memref<128x128xf32, #tpu.memory_space<vmem>>, %arg4: memref<1x128xf32, #tpu.memory_space<vmem>>, %arg5: memref<8x128xf32, #tpu.memory_space<vmem>>) attributes {dimension_semantics = [#tpu.dimension_semantics<parallel>, #tpu.dimension_semantics<parallel>], iteration_bounds = array<i64: 1, 2>, scalar_prefetch = 0 : i64, scratch_operands = 0 : i64, tpu.core_type = #tpu.core_type<tc>, window_params = [{transform_indices = @transform_0, window_bounds = array<i64: 8, 128>}, {transform_indices = @transform_1, window_bounds = array<i64: 128, 128>}, {transform_indices = @transform_2, window_bounds = array<i64: 1, 128>}, {transform_indices = @transform_3, window_bounds = array<i64: 8, 128>}]} {
    %c0 = arith.constant 0 : index
    %c0_0 = arith.constant 0 : index
    %0 = vector.load %arg2[%c0, %c0_0] : memref<8x128xf32, #tpu.memory_space<vmem>>, vector<8x128xf32>
    %c0_1 = arith.constant 0 : index
    %c0_2 = arith.constant 0 : index
    %1 = vector.load %arg3[%c0_1, %c0_2] : memref<128x128xf32, #tpu.memory_space<vmem>>, vector<128x128xf32>
    %cst = arith.constant dense<0.000000e+00> : vector<8x128xf32>
    %2 = tpu.matmul %0, %1, %cst {dimension_numbers = #tpu.dot_dimension_numbers<[1], [0], [0], [1], [0, 0, 1, 1], [], []>} : vector<8x128xf32>, vector<128x128xf32>, vector<8x128xf32> -> vector<8x128xf32>
    %c0_3 = arith.constant 0 : index
    %c0_4 = arith.constant 0 : index
    %3 = vector.load %arg4[%c0_3, %c0_4] : memref<1x128xf32, #tpu.memory_space<vmem>>, vector<1x128xf32>
    %4 = vector.broadcast %3 : vector<1x128xf32> to vector<8x128xf32>
    %5 = arith.addf %2, %4 : vector<8x128xf32>
    %c0_5 = arith.constant 0 : index
    %c0_6 = arith.constant 0 : index
    %6 = vector.load %arg5[%c0_5, %c0_6] : memref<8x128xf32, #tpu.memory_space<vmem>>, vector<8x128xf32>
    tpu.vector_store %arg5[%c0_5, %c0_6], %5 {strides = array<i32>} : memref<8x128xf32, #tpu.memory_space<vmem>>, vector<8x128xf32>,
    return
  }
  func.func @transform_0(%arg0: i32, %arg1: i32) -> (i32, i32) {
    %c0_i32 = arith.constant 0 : i32
    %c0_i32_0 = arith.constant 0 : i32
    return %arg0, %c0_i32 : i32, i32
  }
  func.func @transform_1(%arg0: i32, %arg1: i32) -> (i32, i32) {
    %c0_i32 = arith.constant 0 : i32
    %c0_i32_0 = arith.constant 0 : i32
    return %c0_i32, %arg1 : i32, i32
  }
  func.func @transform_2(%arg0: i32, %arg1: i32) -> (i32, i32) {
    %c0_i32 = arith.constant 0 : i32
    %c0_i32_0 = arith.constant 0 : i32
    return %c0_i32, %arg1 : i32, i32
  }
  func.func @transform_3(%arg0: i32, %arg1: i32) -> (i32, i32) {
    %c0_i32 = arith.constant 0 : i32
    return %arg0, %arg1 : i32, i32
  }
}

</mosaic_0001>

<bundles_post_ra>
// kernel: tpu_custom_call.1
= control target key start
LH: loop header
LB: loop body
LE: loop exit
PB: predicated region body
PF: predicated region fallthrough
CT: control target
= control target key end

     0   :  { %8 = vsyncpa [#allocation3], 0  ;;  %s1039_s0 = inlined_call_operand.hbm [shape: f32[8,128], index: 0, kind: input, shape index: {}]   ;;  %s1040_s1 = inlined_call_operand.hbm [shape: f32[128,256], index: 1, kind: input, shape index: {}]   ;;  %s1041_s2 = inlined_call_operand.vmem [shape: f32[1,256], index: 2, kind: input, shape index: {}]   ;;  %s1042_s3 = inlined_call_operand.hbm [shape: f32[8,256], index: 3, kind: output, shape index: {}]  }
   0x1   :  { %9 = vsyncpa [#allocation6], 0 }
   0x2   :  { %11 = vsyncpa [#allocation6 + $0x1], 0 }
   0x3   :  { %12 = vsyncpa [#allocation4], 0 }
   0x4   :  { %14 = vsyncpa [#allocation4 + $0x1], 0  ;;  %s796_s12 = smov 0   ;;  %s798_s13 = smov 0  }
   0x5   :  { %s800_s14 = smov 0   ;;  %s802_s15 = smov 0  }
   0x6   :  { %s804_s16 = smov 0   ;;  %s806_s17 = smov 0  }
   0x7 LB: > { %s450_s18 = sadd.s32 4294967295, %s765_s17   ;;  %s451_s19 = sadd.s32 4294967294, %s765_s17   ;;  %s765_s17 = sphi %s806_s17, %s20_s17   ;;  %s761_s16 = sphi %s804_s16, %s1070_s16   ;;  %s757_s15 = sphi %s802_s15, %s1069_s15   ;;  %s753_s14 = sphi %s800_s14, %s1068_s14   ;;  %s749_s13 = sphi %s798_s13, %s1067_s13   ;;  %s745_s12 = sphi %s796_s12, %s1066_s12  }
   0x8   : > { %s65_s20 = sadd.s32 1, %s753_s14  ;;  %p72_p0 = scmp.ne.s32.totalorder %s753_s14, %s749_s13 }
   0x9   : > { %p73_p1 = scmp.eq.s32.totalorder %s765_s17, 0  ;;  %p78_p2 = scmp.ne.s32.totalorder %s749_s13, %s745_s12 }
   0xa   : > { %p834_p3 = scmp.eq.s32.totalorder %s450_s18, 0  ;;  %p130_p4 = scmp.eq.s32.totalorder %s450_s18, 1 }
   0xb   : > { %p838_p5 = por %p73_p1, %p72_p0  ;;  %p136_p6 = scmp.eq.s32.totalorder %s451_s19, 1 }
   0xc   : > { %s1049_s21 = scalar_select %p834_p3, 1, 0 }
   0xd   : > { %p844_p7 = por %p834_p3, %p78_p2  ;;  %p848_p8 = por %p130_p4, %p72_p0 }
   0xe   : > { %p852_p9 = por %p136_p6, %p78_p2  ;;  %p452_p10 = scmp.ge.s32.totalorder %s765_s17, 1 }
   0xf   : > { %s1051_s23 = scalar_select %p844_p7, 1, 0 }
  0x10   : > { %s1052_s24 = scalar_select %p848_p8, 1, 0 }
  0x11   : > { %s1053_s25 = scalar_select %p852_p9, 1, 0 }
  0x12   : > { %p143_p11 = scmp.lt.s32.totalorder %s765_s17, 3  ;;  %s767_s27 = smov [#allocation2]  }
  0x13   : > { %s158_s28 = sshll.u32 %s767_s27, 4  ;;  %p563_p1 = scmp.lt.s32.totalorder %s765_s17, 2  ;;  %s159_s28 = int_to_ptr.vmem [resolvable:$true] %s158_s28 }
  0x14   : > { %p859_p13 = pnand %p452_p10, %p143_p11  ;;  %s29_s4 = sadd.s32 1, %s761_s16 }
  0x15   : > { %p868_p4 = pnand %p563_p1, %p838_p5  ;;  %p879_p6 = scmp.ge.s32.totalorder %s29_s4, 2 }
  0x16   : > { %s1054_s26 = scalar_select %p859_p13, 1, 0 }
  0x17   : > { %p550_p0 = pneg %p859_p13  ;;  %s169_s6 = sand.u32 1, %s753_s14  }
  0x18   : > { %s1055_s29 = scalar_select %p868_p4, 1, 0 }
  0x19   : > { %p874_p2 = pnand %p550_p0, %p834_p3  ;;  %s621_s9 = scalar_lea.hbm %s1039_s0, 128 }
  0x1a   : > { %s1057_s5 = scalar_select %p879_p6, 1, 0 }
  0x1b   : > { %p622_p5 = scmp.ne.s32.totalorder %s1039_s0, %s621_s9  ;;  %p623_p10 = pneg %p874_p2 }
  0x1c   : > { %p628_p0 = scmp.lt.u32.totalorder %s621_s9, %s1039_s0 }
  0x1d   : > { %p624_p11 = pnand %p623_p10, %p622_p5 }
  0x1f   : > { %p625_p1 = pneg %p624_p11 }
  0x21   : > { %p630_p12 = pnand %p628_p0, %p625_p1 }
  0x23   : > { %633 = shalt.err (!%p630_p12)
}
  0x24   : > { %s634_s22 = scalar_lea.vmem %s159_s28, 128  ;;  %p642_p3 = scmp.lt.s32.totalorder %s159_s28, %s159_s28 }
  0x25   : > { %p635_p9 = scmp.ne.s32.totalorder %s159_s28, %s634_s22  ;;  %p643_p13 = scmp.lt.s32.totalorder %s634_s22, %s634_s22 }
  0x27   : > { %p637_p8 = pnand %p635_p9, %p623_p10  ;;  %p644_p4 = por %p643_p13, %p642_p3 }
  0x29   : > { %p638_p7 = pneg %p637_p8 }
  0x2b   : > { %p645_p6 = pnand %p644_p4, %p638_p7 }
  0x2d   : > { %648 = shalt.err (!%p645_p6)
}
  0x2e   : > { %553 = dma.hbm_to_vmem [thread:$0]  (!%p874_p2), %s1039_s0, 128, %s159_s28, [#allocation3]  }
  0x2f   : > { %p1058_p9 = scmp.ne.s32.totalorder %s1057_s5, 0  ;;  %s455_s8 = sshll.u32 %s169_s6, 7 }
  0x30   : > { %s456_s10 = sshll.u32 %s761_s16, 7  ;;  %s173_s19 = scalar_lea.vmem [#allocation5], %s455_s8 }
  0x31   : > { %s1072_s4 = smov (%p1058_p9, %s29_s4), 0  ;;  %s910_s18 = scalar_lea.hbm %s1040_s1, %s456_s10 }
  0x32   : > { %s62_s9 = ssub.s32 %s761_s16, %s1072_s4  ;;  %s179_s22 = sshll.u32 %s173_s19, 4  ;;  %s917_s22 = int_to_ptr.vmem [resolvable:$true] %s179_s22 }
  0x33   : > { %p63_p3 = scmp.eq.s32.totalorder %s62_s9, 0  ;;  %s919_s5 = scalar_lea.sflag [#allocation6], %s169_s6 }
  0x34   : > { %s649_s27 = scalar_lea.hbm %s910_s18, 2048  ;;  %p1059_p8 = scmp.ne.s32.totalorder %s1055_s29, 0 }
  0x35   : > { %s915_s28 = scalar_select %p63_p3, %s753_s14, %s65_s20  }
  0x36   : > { %p650_p7 = scmp.ne.s32.totalorder %s910_s18, %s649_s27  ;;  %p651_p12 = pneg %p1059_p8 }
  0x37   : > { %s654_s8 = scalar_lea.hbm %s1040_s1, 4096  ;;  %p655_p2 = scmp.lt.u32.totalorder %s910_s18, %s1040_s1 }
  0x38   : > { %p652_p13 = pnand %p651_p12, %p650_p7  ;;  %p656_p6 = scmp.lt.u32.totalorder %s654_s8, %s649_s27 }
  0x39   : > { %p658_p10 = scmp.lt.u32.totalorder %s649_s27, %s910_s18 }
  0x3a   : > { %p653_p4 = pneg %p652_p13  ;;  %p657_p5 = por %p656_p6, %p655_p2 }
  0x3c   : > { %p659_p11 = por %p658_p10, %p657_p5 }
  0x3e   : > { %p660_p1 = pnand %p659_p11, %p653_p4 }
  0x40   : > { %663 = shalt.err (!%p660_p1)
}
  0x41   : > { %s664_s20 = scalar_lea.vmem %s917_s22, 2048  ;;  %s768_s6 = smov [#allocation5]  }
  0x42   : > { %p665_p0 = scmp.ne.s32.totalorder %s917_s22, %s664_s20  ;;  %s669_s11 = sshll.u32 %s768_s6, 4  ;;  %s670_s11 = int_to_ptr.vmem [resolvable:$false] %s669_s11 }
  0x43   : > { %s671_s19 = scalar_lea.vmem %s670_s11, 4096  ;;  %p672_p7 = scmp.lt.s32.totalorder %s917_s22, %s670_s11 }
  0x44   : > { %p667_p9 = pnand %p665_p0, %p651_p12  ;;  %p673_p13 = scmp.lt.s32.totalorder %s671_s19, %s664_s20 }
  0x46   : > { %p668_p3 = pneg %p667_p9  ;;  %p674_p2 = por %p673_p13, %p672_p7 }
  0x48   : > { %p675_p6 = pnand %p674_p2, %p668_p3 }
  0x4a   : > { %678 = shalt.err (!%p675_p6)
}
  0x4b   : > { %s769_s27 = smov 256   ;;  %s770_s7 = smov 128  }
  0x4c   : > { %s771_s9 = smov 8   ;;  %p1060_p12 = scmp.ne.s32.totalorder %s1054_s26, 0 }
  0x4d   : > { %557 = dma.hbm_to_vmem [thread:$0]  (!%p1059_p8), %s910_s18, 2048, %s917_s22, %s919_s5, %s769_s27, %s770_s7, %s771_s9  }
  0x4e   : > { %197 = sbr.rel (%p1060_p12) target bundleno = 352 (0x160), region = 32  ;;  %p1061_p4 = scmp.ne.s32.totalorder (!%p1060_p12), %s1049_s21, 0 }
  0x55   : > { %732 = dma.done.wait (%p1061_p4), [#allocation3], 128  }
  0x56   : > { %734 = vsyncadd (%p1061_p4), [#allocation3], 4294967168  ;;  %s954_s8 = sand.u32 1, %s749_s13   ;;  %p1062_p8 = scmp.ne.s32.totalorder %s1051_s23, 0 }
  0x57   : > { %s459_s10 = sshll.u32 %s954_s8, 7  ;;  %s204_s30 = scalar_lea.sflag [#allocation6], %s954_s8 }
  0x58   : > { %s958_s20 = scalar_lea.vmem [#allocation5], %s459_s10 }
  0x59   : > { %736 = dma.done.wait (%p1062_p8), %s204_s30, 2048  }
  0x5a   : > { %738 = vsyncadd (%p1062_p8), %s204_s30, 4294965248  ;;  %v772_v0 = vmov 0.0|0.0   ;;  %vm773_vm0 = vmmov 0   ;;  %v774_v1 = vmov 0.0   ;;  %v237_v2 = vld [vmem:[%s958_s20] sm:$0xff]  ;;  %v238_v3 = vld [vmem:[%s958_s20 + $0x8] sm:$0xff] }
  0x5b   : > { %518 = vmatprep.subr.bf16.mxu0 %v772_v0  ;;  %515 = vmatprep.mubr.msk.f32.mxu0 %vm773_vm0, %v774_v1  ;;  %v239_v4 = vld [vmem:[%s958_s20 + $0x10] sm:$0xff]  ;;  %v519_v5 = vpack.c.bf16 %v238_v3, %v237_v2  ;;  %v240_v6 = vld [vmem:[%s958_s20 + $0x18] sm:$0xff]  ;;  %v241_v8 = vld [vmem:[%s958_s20 + $0x20] sm:$0xff]  ;;  %p233_p5 = scmp.lt.s32.totalorder %s757_s15, 1  ;;  %s460_s23 = sshll.u32 %s954_s8, 3 }
  0x5c   : > { %v522_v7 = vpack.c.bf16 %v240_v6, %v239_v4  ;;  %v242_v9 = vld [vmem:[%s958_s20 + $0x28] sm:$0xff]  ;;  %v243_v11 = vld [vmem:[%s958_s20 + $0x30] sm:$0xff]  ;;  %v244_v12 = vld [vmem:[%s958_s20 + $0x38] sm:$0xff]  ;;  %s463_s22 = sshll.u32 %s757_s15, 7  ;;  %s232_s5 = scalar_lea.vmem [#allocation7], %s460_s23 }
  0x5d   : > { %520 = vmatpush3.bf16.msra.mxu0 %v519_v5  ;;  %v525_v10 = vpack.c.bf16 %v242_v9, %v241_v8  ;;  %v528_v13 = vpack.c.bf16 %v244_v12, %v243_v11  ;;  %v245_v14 = vld [vmem:[%s958_s20 + $0x40] sm:$0xff]  ;;  %v246_v15 = vld [vmem:[%s958_s20 + $0x48] sm:$0xff]  ;;  %v247_v17 = vld [vmem:[%s958_s20 + $0x50] sm:$0xff]  ;;  %s234_s21 = scalar_select %p233_p5, %s757_s15, 1 }
  0x5e   : > { %521 = vmatprep.subr.bf16.mxu0 %v772_v0  ;;  %v531_v16 = vpack.c.bf16 %v246_v15, %v245_v14  ;;  %v248_v18 = vld [vmem:[%s958_s20 + $0x58] sm:$0xff]  ;;  %v249_v20 = vld [vmem:[%s958_s20 + $0x60] sm:$0xff]  ;;  %v250_v21 = vld [vmem:[%s958_s20 + $0x68] sm:$0xff]  ;;  %s347_s6 = sshll.u32 %s232_s5, 4  ;;  %s990_s27 = scalar_lea.hbm %s1042_s3, %s463_s22  ;;  %s992_s6 = int_to_ptr.vmem [resolvable:$true] %s347_s6 }
  0x5f   : > { %v534_v19 = vpack.c.bf16 %v248_v18, %v247_v17  ;;  %v537_v22 = vpack.c.bf16 %v250_v21, %v249_v20  ;;  %v251_v23 = vld [vmem:[%s958_s20 + $0x70] sm:$0xff]  ;;  %v252_v24 = vld [vmem:[%s958_s20 + $0x78] sm:$0xff]  ;;  %s235_s18 = scalar_lea.vmem %s1041_s2, %s234_s21  ;;  %s332_s7 = scalar_lea.sflag [#allocation4], %s954_s8 }
  0x60   : > { %v540_v25 = vpack.c.bf16 %v252_v24, %v251_v23  ;;  %v236_v26 = vld [vmem:[#allocation2] sm:$0xff]  ;;  %s679_s9 = scalar_lea.vmem %s992_s6, 128  ;;  %p1063_p11 = scmp.ne.s32.totalorder %s1052_s24, 0 }
  0x61   : > { %523 = vmatpush3.bf16.msra.mxu0 %v522_v7  ;;  %v461_v27 = vld [vmem:[%s235_s18] ss:$0 sm:$0xff]  ;;  %p680_p10 = scmp.ne.s32.totalorder %s992_s6, %s679_s9  ;;  %s775_s15 = smov [#allocation7]  }
  0x62   : > { %524 = vmatprep.subr.bf16.mxu0 %v772_v0  ;;  %s683_s10 = sshll.u32 %s775_s15, 4  ;;  %s684_s10 = int_to_ptr.vmem [resolvable:$false] %s683_s10 }
  0x63   : > { %p681_p1 = pnand %p680_p10, %p1063_p11  ;;  %s685_s30 = scalar_lea.vmem %s684_s10, 256 }
  0x64   : > { %p686_p9 = scmp.lt.s32.totalorder %s992_s6, %s684_s10  ;;  %p687_p3 = scmp.lt.s32.totalorder %s685_s30, %s679_s9 }
  0x65   : > { %526 = vmatpush3.bf16.msra.mxu0 %v525_v10  ;;  %p682_p0 = pneg %p681_p1 }
  0x66   : > { %527 = vmatprep.subr.bf16.mxu0 %v772_v0  ;;  %p688_p7 = por %p687_p3, %p686_p9 }
  0x68   : > { %p689_p13 = pnand %p688_p7, %p682_p0 }
  0x69   : > { %529 = vmatpush3.bf16.msra.mxu0 %v528_v13 }
  0x6a   : > { %530 = vmatprep.subr.bf16.mxu0 %v772_v0 }
  0x6d   : > { %532 = vmatpush3.bf16.msra.mxu0 %v531_v16 }
  0x6e   : > { %533 = vmatprep.subr.bf16.mxu0 %v772_v0 }
  0x71   : > { %535 = vmatpush3.bf16.msra.mxu0 %v534_v19 }
  0x72   : > { %536 = vmatprep.subr.bf16.mxu0 %v772_v0 }
  0x75   : > { %538 = vmatpush3.bf16.msra.mxu0 %v537_v22 }
  0x76   : > { %539 = vmatprep.subr.bf16.mxu0 %v772_v0 }
  0x79   : > { %541 = vmatpush3.bf16.msra.mxu0 %v540_v25 }
  0x7c   : > { %516 = vmatmul.mubr.f32.vlgmr.msra.gmra.mrb[0].mxu0 %v236_v26 }
 0x14f   : > { %v326_v28 = vpop.f32.mrb[0].mxu0 }
 0x150   : > { %v327_v29 = vadd.f32 %v461_v27, %v326_v28  ;;  %v517_v30 = vpop.f32.mrb[1].mxu0 }
 0x152   : > { %330 = vst [vmem:[%s232_s5] sm:$0xff] %v327_v29 }
 0x153   : > { %692 = shalt.err (!%p689_p13)
}
 0x154   : > { %s693_s8 = scalar_lea.hbm %s990_s27, 128  ;;  %s697_s23 = scalar_lea.hbm %s1042_s3, 256 }
 0x155   : > { %p694_p2 = scmp.ne.s32.totalorder %s990_s27, %s693_s8  ;;  %p698_p4 = scmp.lt.u32.totalorder %s990_s27, %s1042_s3 }
 0x156   : > { %p699_p8 = scmp.lt.u32.totalorder %s697_s23, %s693_s8  ;;  %p701_p10 = scmp.lt.u32.totalorder %s693_s8, %s990_s27 }
 0x157   : > { %p695_p6 = pnand %p694_p2, %p1063_p11 }
 0x158   : > { %p700_p5 = por %p699_p8, %p698_p4 }
 0x159   : > { %p696_p12 = pneg %p695_p6 }
 0x15a   : > { %p702_p1 = por %p701_p10, %p700_p5 }
 0x15c   : > { %p703_p0 = pnand %p702_p1, %p696_p12 }
 0x15e   : > { %706 = shalt.err (!%p703_p0)
}
 0x15f   : > { %548 = dma.vmem_to_hbm [thread:$0]  (%p1063_p11), %s992_s6, 128, %s990_s27, %s332_s7  }
 0x160 PF: > { %s359_s18 = sand.u32 1, %s745_s12   ;;  %p1064_p9 = scmp.ne.s32.totalorder %s1053_s25, 0 }
 0x161   : > { %p1065_p3 = scmp.ge.s32.totalorder %s765_s17, 2  ;;  %s360_s22 = scalar_lea.sflag [#allocation4], %s359_s18 }
 0x163   : > { %p559_p7 = pnand %p1065_p3, %p1064_p9 }
 0x165   : > { %740 = dma.done.wait (!%p559_p7), %s360_s22, 128  }
 0x166   : > { %742 = vsyncadd (!%p559_p7), %s360_s22, 4294967168  ;;  %s20_s17 = sadd.s32 1, %s765_s17   ;;  %s1066_s12 = smov %s749_s13 }
 0x167   : > { %p17_p13 = scmp.ge.s32.totalorder %s20_s17, 4   ;;  %s1067_s13 = smov %s753_s14 }
 0x168   : > { %s1068_s14 = smov %s915_s28  ;;  %s1069_s15 = smov %s761_s16 }
 0x169   : > { %s1070_s16 = smov %s1072_s4  ;;  %19 = sbr.rel (!%p17_p13) target bundleno = 7 (0x7), region = 86 }
 0x170   :  { %365 = vsyncpa [#allocation3], 1 }
 0x171   :  { %367 = vsyncpa [#allocation3 + $0x1], 1 }
 0x172   :  { %368 = vsyncpa [#allocation6], 1 }
 0x173   :  { %370 = vsyncpa [#allocation6 + $0x1], 1 }
 0x174   :  { %371 = vsyncpa [#allocation4], 1 }
 0x175   :  { %373 = vsyncpa [#allocation4 + $0x1], 1 }

</bundles_post_ra>
